<compile_context>
chip_gen: v7x
topology: tpu7x:2x2x1
jax: 0.10.0
libtpu: 0.0.40
codegen_flags: <defaults>
</compile_context>

<pallas_src>
import jax
import jax.numpy as jnp
from jax.experimental import pallas as pl
from jax.experimental.pallas import tpu as pltpu

NEG_BIG = -1e30  # effectively -inf for f32 log_softmax padding (exp -> 0 exactly)


def embnet_kernel(ids_ref, rep_ref, m_ref, b_ref, out_ref):
    """ids_ref: (B, S)  int32 -- token ids.
       rep_ref: (S, S*V) f32  -- 0/1 lane-expansion matrix (repeat each position V times).
       m_ref:   (S*V, C_pad) f32 -- folded Embedding+Linear matrix, zero-padded classes.
       b_ref:   (1, C_pad)  f32 -- fc bias, padded classes = NEG_BIG.
       out_ref: (B, C_pad)  f32 -- log-probs (padded classes ~ -inf)."""
    B, S = ids_ref.shape
    SV = rep_ref.shape[1]
    V = SV // S

    # Combined (position, vocab) index per token: ids[b, s] + s*V, as exact
    # small-integer floats (all values < 2^24, so float math below is exact).
    pos = jax.lax.broadcasted_iota(jnp.int32, (B, S), 1)
    ids_off = (ids_ref[...] + pos * V).astype(jnp.float32)              # (B, S)

    # Lane-expand each position's value across its V-wide vocab slot with a
    # tiny 0/1 matmul -- avoids any in-kernel minor-dim reshape / repeat.
    ids_rep = jnp.dot(ids_off, rep_ref[...],
                      preferred_element_type=jnp.float32)               # (B, S*V)

    # One-hot over the combined index: column j = s*V + v is hot iff
    # v == ids[b, s]  (i.e. j == ids[b, s] + s*V).  Pure VPU filler.
    j = jax.lax.broadcasted_iota(jnp.int32, (B, SV), 1).astype(jnp.float32)
    onehot = (j == ids_rep).astype(jnp.float32)                         # (B, S*V)

    # Fused embedding-gather + flatten + Linear in ONE MXU matmul against the
    # precomputed combined matrix, plus bias (padded classes get NEG_BIG).
    logits = jnp.dot(onehot, m_ref[...],
                     preferred_element_type=jnp.float32) + b_ref[...]   # (B, C_pad)

    # Numerically stable log_softmax over the lane-dense class axis (f32).
    # Padded classes carry logit ~ -1e30: never win the max, exp -> 0 exactly.
    mx = jnp.max(logits, axis=-1, keepdims=True)
    shifted = logits - mx
    lse = jnp.log(jnp.sum(jnp.exp(shifted), axis=-1, keepdims=True))
    out_ref[...] = shifted - lse                                        # (B, C_pad)


def prepare_embnet_params(emb_table, fc_w, fc_b, seq_len):
    """One-time parameter preparation (hoisted out of the per-call path).

    emb_table: (V, H1); fc_w: (C, S*H1); fc_b: (C,).
    Returns (m_pad, b_pad, rep, C) ready to feed to embnet_forward."""
    V, H1 = emb_table.shape
    C, H2 = fc_w.shape
    S = seq_len
    assert H2 == S * H1, "hidden_size2 must equal seq_len * hidden_size1"

    C_pad = max(128, pl.cdiv(C, 128) * 128)

    # Fold Embedding and Linear (in f32, so summation-order drift stays tiny):
    # M[s*V + v, c] = emb_table[v, :] . fc_w[c, s*H1:(s+1)*H1]
    w3 = fc_w.astype(jnp.float32).reshape(C, S, H1)                      # (C, S, H1)
    m = jnp.einsum('vh,csh->svc', emb_table.astype(jnp.float32),
                   w3).reshape(S * V, C)                                 # (S*V, C)
    m_pad = jnp.zeros((S * V, C_pad), jnp.float32).at[:, :C].set(m)

    # Bias -> (1, C_pad); padded classes get a huge negative logit.
    b_pad = jnp.full((1, C_pad), NEG_BIG, jnp.float32).at[0, :C].set(
        fc_b.astype(jnp.float32))

    # Lane-expansion matrix: rep[s, s*V + v] = 1  (repeats column s, V times).
    rep = jnp.kron(jnp.eye(S, dtype=jnp.float32),
                   jnp.ones((1, V), jnp.float32))                        # (S, S*V)

    return m_pad, b_pad, rep, C


def embnet_forward(ids, params):
    """ids: (B, S) int32 token ids; params: output of prepare_embnet_params."""
    m_pad, b_pad, rep, C = params
    B, S = ids.shape
    C_pad = m_pad.shape[1]

    vmem = pl.BlockSpec(memory_space=pltpu.MemorySpace.VMEM)
    # TODO(synk): for large B on v7x, add a grid over B with
    # dimension_semantics=("parallel",) to engage the second TensorCore.
    out_pad = pl.pallas_call(
        embnet_kernel,
        out_shape=jax.ShapeDtypeStruct((B, C_pad), jnp.float32),
        in_specs=[vmem, vmem, vmem, vmem],
        out_specs=vmem,
    )(ids.astype(jnp.int32), rep, m_pad, b_pad)

    return out_pad[:, :C]


def embnet_reference(ids, emb_table, fc_w, fc_b):
    embeds = emb_table[ids]                                              # (B, S, H1)
    flat = embeds.reshape(ids.shape[0], -1)                              # (B, S*H1)
    logits = flat @ fc_w.T + fc_b                                        # (B, C)
    return jax.nn.log_softmax(logits, axis=-1)


if __name__ == "__main__":
    # Small shapes consistent with the module: emb_size=64 vocab,
    # hidden_size1=16 embedding dim, seq=8 tokens -> hidden_size2=128, 3 classes.
    B, S = 8, 8
    V, H1 = 64, 16
    H2 = S * H1
    C = 3

    key = jax.random.PRNGKey(0)
    k_ids, k_emb, k_w, k_b = jax.random.split(key, 4)

    ids = jax.random.randint(k_ids, (B, S), 0, V, dtype=jnp.int32)
    emb_table = jax.random.normal(k_emb, (V, H1), dtype=jnp.float32) * 0.1
    fc_w = jax.random.normal(k_w, (C, H2), dtype=jnp.float32) * 0.05
    fc_b = jax.random.normal(k_b, (C,), dtype=jnp.float32) * 0.01

    # One-time parameter preparation (not part of the per-forward path).
    params = jax.tree_util.tree_map(jax.block_until_ready,
                                    prepare_embnet_params(emb_table, fc_w, fc_b, S))

    out = embnet_forward(ids, params)
    out = jax.block_until_ready(out)

    ref = embnet_reference(ids, emb_table, fc_w, fc_b)
    assert out.shape == (B, C)
    assert jnp.allclose(out, ref, atol=1e-5, rtol=1e-5), "mismatch vs reference"

    print("KERNEL_OK")
</pallas_src>

<mosaic_0001>
module attributes {stable_mosaic.version = 11 : i64} {
  func.func @embnet_kernel(%arg0: memref<8x8xi32, #tpu.memory_space<vmem>>, %arg1: memref<8x512xf32, #tpu.memory_space<vmem>>, %arg2: memref<512x128xf32, #tpu.memory_space<vmem>>, %arg3: memref<1x128xf32, #tpu.memory_space<vmem>>, %arg4: memref<8x128xf32, #tpu.memory_space<vmem>>) attributes {dimension_semantics = [], scalar_prefetch = 0 : i64, scratch_operands = 0 : i64, tpu.core_type = #tpu.core_type<tc>} {
    %0 = tpu.iota {dimensions = array<i32: 1>} : vector<8x8xi32>
    %c0 = arith.constant 0 : index
    %c0_0 = arith.constant 0 : index
    %1 = vector.load %arg0[%c0, %c0_0] : memref<8x8xi32, #tpu.memory_space<vmem>>, vector<8x8xi32>
    %c64_i32 = arith.constant 64 : i32
    %2 = vector.broadcast %c64_i32 : i32 to vector<8x8xi32>
    %3 = arith.muli %0, %2 : vector<8x8xi32>
    %4 = arith.addi %1, %3 : vector<8x8xi32>
    %5 = arith.sitofp %4 : vector<8x8xi32> to vector<8x8xf32>
    %c0_1 = arith.constant 0 : index
    %c0_2 = arith.constant 0 : index
    %6 = vector.load %arg1[%c0_1, %c0_2] : memref<8x512xf32, #tpu.memory_space<vmem>>, vector<8x512xf32>
    %cst = arith.constant dense<0.000000e+00> : vector<8x512xf32>
    %7 = tpu.matmul %5, %6, %cst {dimension_numbers = #tpu.dot_dimension_numbers<[1], [0], [0], [1], [0, 0, 1, 1], [], []>} : vector<8x8xf32>, vector<8x512xf32>, vector<8x512xf32> -> vector<8x512xf32>
    %8 = tpu.iota {dimensions = array<i32: 1>} : vector<8x512xi32>
    %9 = arith.sitofp %8 : vector<8x512xi32> to vector<8x512xf32>
    %10 = arith.cmpf oeq, %9, %7 : vector<8x512xf32>
    %11 = arith.extui %10 : vector<8x512xi1> to vector<8x512xi32>
    %12 = arith.sitofp %11 : vector<8x512xi32> to vector<8x512xf32>
    %c0_3 = arith.constant 0 : index
    %c0_4 = arith.constant 0 : index
    %13 = vector.load %arg2[%c0_3, %c0_4] : memref<512x128xf32, #tpu.memory_space<vmem>>, vector<512x128xf32>
    %cst_5 = arith.constant dense<0.000000e+00> : vector<8x128xf32>
    %14 = tpu.matmul %12, %13, %cst_5 {dimension_numbers = #tpu.dot_dimension_numbers<[1], [0], [0], [1], [0, 0, 1, 1], [], []>} : vector<8x512xf32>, vector<512x128xf32>, vector<8x128xf32> -> vector<8x128xf32>
    %c0_6 = arith.constant 0 : index
    %c0_7 = arith.constant 0 : index
    %15 = vector.load %arg3[%c0_6, %c0_7] : memref<1x128xf32, #tpu.memory_space<vmem>>, vector<1x128xf32>
    %16 = vector.broadcast %15 : vector<1x128xf32> to vector<8x128xf32>
    %17 = arith.addf %14, %16 : vector<8x128xf32>
    %cst_8 = arith.constant dense<0xFF800000> : vector<8xf32>
    %18 = vector.multi_reduction <maximumf>, %17, %cst_8 [1] : vector<8x128xf32> to vector<8xf32>
    %19 = vector.shape_cast %18 : vector<8xf32> to vector<8x1xf32>
    %20 = vector.broadcast %19 : vector<8x1xf32> to vector<8x128xf32>
    %21 = arith.subf %17, %20 : vector<8x128xf32>
    %22 = math.exp %21 : vector<8x128xf32>
    %cst_9 = arith.constant dense<0.000000e+00> : vector<8xf32>
    %23 = vector.multi_reduction <add>, %22, %cst_9 [1] : vector<8x128xf32> to vector<8xf32>
    %24 = vector.shape_cast %23 : vector<8xf32> to vector<8x1xf32>
    %25 = math.log %24 : vector<8x1xf32>
    %26 = vector.broadcast %25 : vector<8x1xf32> to vector<8x128xf32>
    %27 = arith.subf %21, %26 : vector<8x128xf32>
    %c0_10 = arith.constant 0 : index
    %c0_11 = arith.constant 0 : index
    %28 = vector.load %arg4[%c0_10, %c0_11] : memref<8x128xf32, #tpu.memory_space<vmem>>, vector<8x128xf32>
    tpu.vector_store %arg4[%c0_10, %c0_11], %27 {strides = array<i32>} : memref<8x128xf32, #tpu.memory_space<vmem>>, vector<8x128xf32>,
    return
  }
}

</mosaic_0001>

<bundles_post_ra>
// kernel: tpu_custom_call.1
= control target key start
LH: loop header
LB: loop body
LE: loop exit
PB: predicated region body
PF: predicated region fallthrough
CT: control target
= control target key end

     0   :  { %9 = vsyncpa [#allocation3], 0  ;;  %s812_s0 = inlined_call_operand.hbm [shape: s32[8,8], index: 0, kind: input, shape index: {}]   ;;  %s813_s1 = inlined_call_operand.hbm [shape: f32[8,512], index: 1, kind: input, shape index: {}]   ;;  %s814_s2 = inlined_call_operand.hbm [shape: f32[512,128], index: 2, kind: input, shape index: {}]   ;;  %s815_s3 = inlined_call_operand.vmem [shape: f32[1,128], index: 3, kind: input, shape index: {}]   ;;  %s816_s4 = inlined_call_operand.hbm [shape: f32[8,128], index: 4, kind: output, shape index: {}]  }
   0x1   :  { %10 = vsyncpa [#allocation6], 0 }
   0x2   :  { %11 = vsyncpa [#allocation4], 0  ;;  %s719_s15 = smov [#allocation5]   ;;  %s720_s17 = smov [#allocation2]  }
   0x3   :  { %s28_s16 = sshll.u32 %s719_s15, 4  ;;  %s18_s18 = sshll.u32 %s720_s17, 4  ;;  %s29_s16 = int_to_ptr.vmem [resolvable:$true] %s28_s16  ;;  %s19_s18 = int_to_ptr.vmem [resolvable:$true] %s18_s18 }
   0x4   :  { %s625_s21 = scalar_lea.hbm %s813_s1, 512 }
   0x5   :  { %p626_p0 = scmp.ne.s32.totalorder %s813_s1, %s625_s21  ;;  %p629_p1 = scmp.lt.u32.totalorder %s625_s21, %s813_s1 }
   0x7   :  { %p631_p2 = pnand %p629_p1, %p626_p0 }
   0x9   :  { %634 = shalt.err (!%p631_p2)
}
   0xa   :  { %s635_s26 = scalar_lea.vmem %s29_s16, 512  ;;  %p640_p4 = scmp.lt.s32.totalorder %s29_s16, %s29_s16 }
   0xb   :  { %p636_p3 = scmp.ne.s32.totalorder %s29_s16, %s635_s26  ;;  %p641_p5 = scmp.lt.s32.totalorder %s635_s26, %s635_s26 }
   0xd   :  { %p642_p6 = por %p641_p5, %p640_p4 }
   0xf   :  { %p643_p7 = pnand %p642_p6, %p636_p3 }
  0x11   :  { %646 = shalt.err (!%p643_p7)
}
  0x12   :  { %31 = dma.hbm_to_vmem [thread:$0]  %s813_s1, 512, %s29_s16, [#allocation6]  }
  0x13   :  { %s647_s5 = scalar_lea.hbm %s812_s0, 128 }
  0x14   :  { %p648_p8 = scmp.ne.s32.totalorder %s812_s0, %s647_s5  ;;  %p651_p9 = scmp.lt.u32.totalorder %s647_s5, %s812_s0 }
  0x16   :  { %p653_p10 = pnand %p651_p9, %p648_p8 }
  0x18   :  { %656 = shalt.err (!%p653_p10)
}
  0x19   :  { %s657_s10 = scalar_lea.vmem %s19_s18, 128  ;;  %p662_p12 = scmp.lt.s32.totalorder %s19_s18, %s19_s18 }
  0x1a   :  { %p658_p11 = scmp.ne.s32.totalorder %s19_s18, %s657_s10  ;;  %p663_p13 = scmp.lt.s32.totalorder %s657_s10, %s657_s10 }
  0x1c   :  { %p664_p0 = por %p663_p13, %p662_p12 }
  0x1e   :  { %p665_p1 = pnand %p664_p0, %p658_p11 }
  0x20   :  { %668 = shalt.err (!%p665_p1)
}
  0x21   :  { %21 = dma.hbm_to_vmem [thread:$0]  %s812_s0, 128, %s19_s18, [#allocation3]  }
  0x22   :  { %s721_s12 = smov [#allocation7]   ;;  %s669_s16 = scalar_lea.hbm %s814_s2, 8192 }
  0x23   :  { %s37_s13 = sshll.u32 %s721_s12, 4  ;;  %p670_p2 = scmp.ne.s32.totalorder %s814_s2, %s669_s16  ;;  %s38_s13 = int_to_ptr.vmem [resolvable:$true] %s37_s13 }
  0x24   :  { %p673_p3 = scmp.lt.u32.totalorder %s669_s16, %s814_s2 }
  0x26   :  { %p675_p4 = pnand %p673_p3, %p670_p2 }
  0x28   :  { %678 = shalt.err (!%p675_p4)
}
  0x29   :  { %s679_s22 = scalar_lea.vmem %s38_s13, 8192  ;;  %p684_p6 = scmp.lt.s32.totalorder %s38_s13, %s38_s13 }
  0x2a   :  { %p680_p5 = scmp.ne.s32.totalorder %s38_s13, %s679_s22  ;;  %p685_p7 = scmp.lt.s32.totalorder %s679_s22, %s679_s22 }
  0x2c   :  { %p686_p8 = por %p685_p7, %p684_p6 }
  0x2e   :  { %p687_p9 = pnand %p686_p8, %p680_p5 }
  0x30   :  { %690 = shalt.err (!%p687_p9)
}
  0x31   :  { %s722_s0 = smov 128   ;;  %s723_s18 = smov 8  }
  0x32   :  { %43 = dma.hbm_to_vmem [thread:$0]  %s814_s2, 8192, %s38_s13, [#allocation6], %s722_s0, %s722_s0, %s723_s18  }
  0x33   :  { %713 = dma.done.wait [#allocation3], 128  }
  0x34   :  { %714 = vsyncadd [#allocation3], 4294967168 }
  0x35   :  { %715 = dma.done.wait [#allocation6], 8704  }
  0x36   :  { %716 = vsyncadd [#allocation6], 4294958592  ;;  %v55_v0 = vlaneseq  ;;  %v724_v1 = vmov 0.0   ;;  %v62_v4 = vld [vmem:[#allocation5 + $0x8] sm:$0xff]  ;;  %v64_v5 = vld [vmem:[#allocation5 + $0x18] sm:$0xff]  ;;  %vm65_vm0 = vcmask 64512  }
  0x37   :  { %133 = vmatprep.mubr.f32.mxu0 %v724_v1  ;;  %204 = vmatprep.mubr.f32.mxu1 %v724_v1  ;;  %v61_v6 = vld [vmem:[#allocation5] sm:$0xff]  ;;  %v63_v7 = vld [vmem:[#allocation5 + $0x10] sm:$0xff]  ;;  %v57_v8 = vld [vmem:[#allocation2] sm:$0xff]  ;;  %s726_s26 = smov [#allocation8]  }
  0x38   :  { %v788_v2 = vand.u32 127, %v55_v0  ;;  %69 = vmatprep.subr.mxu0 %v62_v4  ;;  %140 = vmatprep.subr.mxu1 %v64_v5  ;;  %v246_v9 = vld [vmem:[#allocation7 + $0x80] sm:$0xff]  ;;  %v247_v11 = vld [vmem:[#allocation7 + $0x88] sm:$0xff]  ;;  %v248_v22 = vld [vmem:[#allocation7 + $0x90] sm:$0xff]  ;;  %s458_s27 = sshll.u32 %s726_s26, 4  ;;  %s459_s27 = int_to_ptr.vmem [resolvable:$true] %s458_s27 }
  0x39   :  { %70 = vmatpush1.msra.mxu0 %v61_v6  ;;  %141 = vmatpush1.msra.mxu1 %v63_v7  ;;  %v278_v12 = vld [vmem:[#allocation7 + $0x180] sm:$0xff]  ;;  %v279_v13 = vld [vmem:[#allocation7 + $0x188] sm:$0xff]  ;;  %v549_v14 = vpack.c.bf16 %v247_v11, %v246_v9  ;;  %v249_v23 = vld [vmem:[#allocation7 + $0x98] sm:$0xff]  ;;  %p696_p11 = scmp.lt.s32.totalorder %s459_s27, %s459_s27 }
  0x3a   :  { %v58_v3 = vmul.u32 64, %v788_v2  ;;  %v581_v15 = vpack.c.bf16 %v279_v13, %v278_v12  ;;  %v230_v16 = vld [vmem:[#allocation7] sm:$0xff]  ;;  %v231_v17 = vld [vmem:[#allocation7 + $0x8] sm:$0xff]  ;;  %v553_v25 = vpack.c.bf16 %v249_v23, %v248_v22  ;;  %v280_v26 = vld [vmem:[#allocation7 + $0x190] sm:$0xff] }
  0x3b   :  { %v262_v18 = vld [vmem:[#allocation7 + $0x100] sm:$0xff]  ;;  %v551_v20 = vpack.c.bf16 %v231_v17, %v230_v16  ;;  %v263_v21 = vld [vmem:[#allocation7 + $0x108] sm:$0xff]  ;;  %550 = vmatprep.subr.bf16.mxu0 %v549_v14  ;;  %v281_v27 = vld [vmem:[#allocation7 + $0x198] sm:$0xff] }
  0x3c   :  { %v59_v10 = vadd.s32 %v58_v3, %v57_v8  ;;  %582 = vmatprep.subr.bf16.mxu1 %v581_v15  ;;  %v583_v24 = vpack.c.bf16 %v263_v21, %v262_v18  ;;  %v232_v28 = vld [vmem:[#allocation7 + $0x10] sm:$0xff]  ;;  %v585_v29 = vpack.c.bf16 %v281_v27, %v280_v26  ;;  %v233_v30 = vld [vmem:[#allocation7 + $0x18] sm:$0xff]  ;;  %v250_v35 = vld [vmem:[#allocation7 + $0xa0] sm:$0xff] }
  0x3d   :  { %v264_v31 = vld [vmem:[#allocation7 + $0x110] sm:$0xff]  ;;  %v265_v32 = vld [vmem:[#allocation7 + $0x118] sm:$0xff]  ;;  %v555_v33 = vpack.c.bf16 %v233_v30, %v232_v28  ;;  %v251_v36 = vld [vmem:[#allocation7 + $0xa8] sm:$0xff] }
  0x3e   :  { %v60_v19 = vcvt.s32.f32 %v59_v10  ;;  %v587_v34 = vpack.c.bf16 %v265_v32, %v264_v31  ;;  %v282_v37 = vld [vmem:[#allocation7 + $0x1a0] sm:$0xff]  ;;  %v557_v38 = vpack.c.bf16 %v251_v36, %v250_v35  ;;  %v283_v39 = vld [vmem:[#allocation7 + $0x1a8] sm:$0xff]  ;;  %v252_v45 = vld [vmem:[#allocation7 + $0xb0] sm:$0xff] }
  0x3f   :  { %v234_v40 = vld [vmem:[#allocation7 + $0x20] sm:$0xff]  ;;  %v235_v41 = vld [vmem:[#allocation7 + $0x28] sm:$0xff]  ;;  %v589_v42 = vpack.c.bf16 %v283_v39, %v282_v37  ;;  %v253_v46 = vld [vmem:[#allocation7 + $0xb8] sm:$0xff] }
  0x40   :  { %468 = vmatmul.mubr.msk.f32.vlgmr.msra.gmra.mrb[0].mxu0 %vm65_vm0, %v60_v19  ;;  %469 = vmatmul.mubr.msk.f32.vlgmr.msra.gmra.mrb[0].mxu1 %vm65_vm0, %v60_v19  ;;  %v266_v43 = vld [vmem:[#allocation7 + $0x120] sm:$0xff]  ;;  %v267_v44 = vld [vmem:[#allocation7 + $0x128] sm:$0xff]  ;;  %v284_v47 = vld [vmem:[#allocation7 + $0x1b0] sm:$0xff]  ;;  %v559_v49 = vpack.c.bf16 %v235_v41, %v234_v40  ;;  %v561_v53 = vpack.c.bf16 %v253_v46, %v252_v45  ;;  %v211_v45 = vadd.s32 128, %v788_v2  ;;  %v213_v46 = vadd.s32 384, %v788_v2 }
  0x41   :  { %552 = vmatpush3.bf16.msra.mxu0 %v551_v20  ;;  %584 = vmatpush3.bf16.msra.mxu1 %v583_v24  ;;  %v285_v48 = vld [vmem:[#allocation7 + $0x1b8] sm:$0xff]  ;;  %v591_v50 = vpack.c.bf16 %v267_v44, %v266_v43  ;;  %v236_v51 = vld [vmem:[#allocation7 + $0x30] sm:$0xff]  ;;  %v254_v57 = vld [vmem:[#allocation7 + $0xc0] sm:$0xff]  ;;  %v212_v44 = vadd.s32 256, %v788_v2 }
  0x42   :  { %554 = vmatprep.subr.bf16.mxu0 %v553_v25  ;;  %586 = vmatprep.subr.bf16.mxu1 %v585_v29  ;;  %v237_v52 = vld [vmem:[#allocation7 + $0x38] sm:$0xff]  ;;  %v593_v54 = vpack.c.bf16 %v285_v48, %v284_v47  ;;  %v268_v55 = vld [vmem:[#allocation7 + $0x130] sm:$0xff]  ;;  %v255_v58 = vld [vmem:[#allocation7 + $0xc8] sm:$0xff]  ;;  %v215_v48 = vcvt.s32.f32 %v211_v45 }
  0x43   :  { %v269_v56 = vld [vmem:[#allocation7 + $0x138] sm:$0xff]  ;;  %v286_v59 = vld [vmem:[#allocation7 + $0x1c0] sm:$0xff]  ;;  %v287_v60 = vld [vmem:[#allocation7 + $0x1c8] sm:$0xff]  ;;  %v563_v61 = vpack.c.bf16 %v237_v52, %v236_v51  ;;  %v565_v1 = vpack.c.bf16 %v255_v58, %v254_v57  ;;  %v216_v47 = vcvt.s32.f32 %v212_v44 }
  0x44   :  { %v595_v62 = vpack.c.bf16 %v269_v56, %v268_v55  ;;  %v238_v63 = vld [vmem:[#allocation7 + $0x40] sm:$0xff]  ;;  %v239_v0 = vld [vmem:[#allocation7 + $0x48] sm:$0xff]  ;;  %v597_v3 = vpack.c.bf16 %v287_v60, %v286_v59  ;;  %v256_v6 = vld [vmem:[#allocation7 + $0xd0] sm:$0xff]  ;;  %v725_v55 = vmov 1.0  }
  0x45   :  { %556 = vmatpush3.bf16.msra.mxu0 %v555_v33  ;;  %588 = vmatpush3.bf16.msra.mxu1 %v587_v34  ;;  %v270_v4 = vld [vmem:[#allocation7 + $0x140] sm:$0xff]  ;;  %v271_v5 = vld [vmem:[#allocation7 + $0x148] sm:$0xff]  ;;  %v257_v7 = vld [vmem:[#allocation7 + $0xd8] sm:$0xff]  ;;  %v567_v10 = vpack.c.bf16 %v239_v0, %v238_v63 }
  0x46   :  { %558 = vmatprep.subr.bf16.mxu0 %v557_v38  ;;  %590 = vmatprep.subr.bf16.mxu1 %v589_v42  ;;  %v288_v8 = vld [vmem:[#allocation7 + $0x1d0] sm:$0xff]  ;;  %v289_v9 = vld [vmem:[#allocation7 + $0x1d8] sm:$0xff]  ;;  %v599_v11 = vpack.c.bf16 %v271_v5, %v270_v4  ;;  %v569_v14 = vpack.c.bf16 %v257_v7, %v256_v6  ;;  %v258_v18 = vld [vmem:[#allocation7 + $0xe0] sm:$0xff] }
  0x47   :  { %v240_v12 = vld [vmem:[#allocation7 + $0x50] sm:$0xff]  ;;  %v241_v13 = vld [vmem:[#allocation7 + $0x58] sm:$0xff]  ;;  %v601_v15 = vpack.c.bf16 %v289_v9, %v288_v8  ;;  %v259_v19 = vld [vmem:[#allocation7 + $0xe8] sm:$0xff] }
  0x48   :  { %v272_v16 = vld [vmem:[#allocation7 + $0x150] sm:$0xff]  ;;  %v273_v17 = vld [vmem:[#allocation7 + $0x158] sm:$0xff]  ;;  %v290_v20 = vld [vmem:[#allocation7 + $0x1e0] sm:$0xff]  ;;  %v571_v22 = vpack.c.bf16 %v241_v13, %v240_v12  ;;  %v573_v25 = vpack.c.bf16 %v259_v19, %v258_v18 }
  0x49   :  { %560 = vmatpush3.bf16.msra.mxu0 %v559_v49  ;;  %592 = vmatpush3.bf16.msra.mxu1 %v591_v50  ;;  %v291_v21 = vld [vmem:[#allocation7 + $0x1e8] sm:$0xff]  ;;  %v603_v23 = vpack.c.bf16 %v273_v17, %v272_v16  ;;  %v242_v24 = vld [vmem:[#allocation7 + $0x60] sm:$0xff]  ;;  %v260_v32 = vld [vmem:[#allocation7 + $0xf0] sm:$0xff]  ;;  %v217_v49 = vcvt.s32.f32 %v213_v46  ;;  %v214_v50 = vcvt.s32.f32 %v788_v2 }
  0x4a   :  { %562 = vmatprep.subr.bf16.mxu0 %v561_v53  ;;  %594 = vmatprep.subr.bf16.mxu1 %v593_v54  ;;  %v605_v26 = vpack.c.bf16 %v291_v21, %v290_v20  ;;  %v243_v27 = vld [vmem:[#allocation7 + $0x68] sm:$0xff]  ;;  %v274_v28 = vld [vmem:[#allocation7 + $0x160] sm:$0xff]  ;;  %v261_v33 = vld [vmem:[#allocation7 + $0xf8] sm:$0xff] }
  0x4b   :  { %v275_v29 = vld [vmem:[#allocation7 + $0x168] sm:$0xff]  ;;  %v575_v30 = vpack.c.bf16 %v243_v27, %v242_v24  ;;  %v292_v34 = vld [vmem:[#allocation7 + $0x1f0] sm:$0xff]  ;;  %v577_v35 = vpack.c.bf16 %v261_v33, %v260_v32  ;;  %v293_v36 = vld [vmem:[#allocation7 + $0x1f8] sm:$0xff] }
  0x4c   :  { %v607_v31 = vpack.c.bf16 %v275_v29, %v274_v28  ;;  %v244_v37 = vld [vmem:[#allocation7 + $0x70] sm:$0xff]  ;;  %v245_v38 = vld [vmem:[#allocation7 + $0x78] sm:$0xff]  ;;  %v609_v39 = vpack.c.bf16 %v293_v36, %v292_v34 }
  0x4d   :  { %564 = vmatpush3.bf16.msra.mxu0 %v563_v61  ;;  %596 = vmatpush3.bf16.msra.mxu1 %v595_v62  ;;  %v579_v40 = vpack.c.bf16 %v245_v38, %v244_v37  ;;  %v276_v41 = vld [vmem:[#allocation7 + $0x170] sm:$0xff]  ;;  %v277_v42 = vld [vmem:[#allocation7 + $0x178] sm:$0xff] }
  0x4e   :  { %566 = vmatprep.subr.bf16.mxu0 %v565_v1  ;;  %598 = vmatprep.subr.bf16.mxu1 %v597_v3  ;;  %v611_v43 = vpack.c.bf16 %v277_v42, %v276_v41  ;;  %v474_v58 = vld [vmem:[%s815_s3] ss:$0 sm:$0xff]  ;;  %s691_s3 = scalar_lea.vmem %s459_s27, 128 }
  0x4f   :  { %p692_p10 = scmp.ne.s32.totalorder %s459_s27, %s691_s3  ;;  %p697_p12 = scmp.lt.s32.totalorder %s691_s3, %s691_s3 }
  0x51   :  { %568 = vmatpush3.bf16.msra.mxu0 %v567_v10  ;;  %600 = vmatpush3.bf16.msra.mxu1 %v599_v11  ;;  %p698_p13 = por %p697_p12, %p696_p11 }
  0x52   :  { %570 = vmatprep.subr.bf16.mxu0 %v569_v14  ;;  %602 = vmatprep.subr.bf16.mxu1 %v601_v15 }
  0x53   :  { %p699_p0 = pnand %p698_p13, %p692_p10 }
  0x55   :  { %572 = vmatpush3.bf16.msra.mxu0 %v571_v22  ;;  %604 = vmatpush3.bf16.msra.mxu1 %v603_v23 }
  0x56   :  { %574 = vmatprep.subr.bf16.mxu0 %v573_v25  ;;  %606 = vmatprep.subr.bf16.mxu1 %v605_v26 }
  0x59   :  { %576 = vmatpush3.bf16.msra.mxu0 %v575_v30  ;;  %608 = vmatpush3.bf16.msra.mxu1 %v607_v31 }
  0x5a   :  { %578 = vmatprep.subr.bf16.mxu0 %v577_v35  ;;  %610 = vmatprep.subr.bf16.mxu1 %v609_v39 }
  0x5d   :  { %580 = vmatpush3.bf16.msra.mxu0 %v579_v40  ;;  %612 = vmatpush3.bf16.msra.mxu1 %v611_v43 }
 0x113   :  { %v135_v51 = vpop.f32.mrb[0].mxu0  ;;  %v206_v52 = vpop.f32.mrb[0].mxu1 }
 0x114   :  { %vm220_vm1 = vcmp.eq.f32.partialorder %v216_v47, %v206_v52  ;;  %v137_v53 = vpop.f32.mrb[1].mxu0  ;;  %v208_v54 = vpop.f32.mrb[1].mxu1  ;;  %vm218_vm4 = vcmp.eq.f32.partialorder %v214_v50, %v135_v51 }
 0x115   :  { %vm219_vm2 = vcmp.eq.f32.partialorder %v215_v48, %v137_v53  ;;  %vm221_vm3 = vcmp.eq.f32.partialorder %v217_v49, %v208_v54 }
 0x116   :  { %475 = vmatprep.mubr.msk.f32.mxu0 %vm219_vm2, %v725_v55  ;;  %477 = vmatprep.mubr.msk.f32.mxu1 %vm221_vm3, %v725_v55 }
 0x117   :  { %476 = vmatmul.mubr.msk.f32.vlgmr.msra.gmra.mrb[2].mxu0 %vm218_vm4, %v725_v55  ;;  %478 = vmatmul.mubr.msk.f32.vlgmr.msra.gmra.mrb[2].mxu1 %vm220_vm1, %v725_v55 }
 0x1ea   :  { %v511_v56 = vpop.f32.mrb[2].mxu0  ;;  %v546_v57 = vpop.f32.mrb[2].mxu1 }
 0x1eb   :  { %v512_v2 = vpop.f32.mrb[3].mxu0  ;;  %v547_v59 = vpop.f32.mrb[3].mxu1 }
 0x1ec   :  { %v513_v60 = vadd.f32 %v512_v2, %v511_v56  ;;  %v548_v61 = vadd.f32 %v547_v59, %v546_v57 }
 0x1ee   :  { %v368_v62 = vadd.f32 %v513_v60, %v474_v58 }
 0x1f0   :  { %v438_v63 = vadd.f32 %v548_v61, %v368_v62 }
 0x1f2   :  { %441 = vmax.xlane.f32.xlu0 %v438_v63 }
 0x27f   :  { %v442_v0 = vpop.xlane.xlu0 %441 }
 0x280   :  { %v443_v1 = vsub.f32 %v438_v63, %v442_v0 }
 0x282   :  { %v444_v3 = vmul.f32 1.442695, %v443_v1 }
 0x284   :  { %621 = vpow2.f32 %v444_v3 }
 0x28e   :  { %v622_v4 = vpop.eup %621 }
 0x28f   :  { %446 = vadd.xlane.f32.xlu0 %v622_v4 }
 0x31c   :  { %v447_v5 = vpop.xlane.xlu0 %446 }
 0x31d   :  { %623 = vlog2.f32 %v447_v5 }
 0x327   :  { %v624_v6 = vpop.eup %623 }
 0x328   :  { %v449_v7 = vmul.f32 0.6931472, %v624_v6 }
 0x32a   :  { %v450_v8 = vsub.f32 %v443_v1, %v449_v7 }
 0x32c   :  { %451 = vst [vmem:[#allocation8] sm:$0xff] %v450_v8 }
 0x32d   :  { %702 = shalt.err (!%p699_p0)
}
 0x32e   :  { %s703_s30 = scalar_lea.hbm %s816_s4, 128 }
 0x32f   :  { %p704_p1 = scmp.ne.s32.totalorder %s816_s4, %s703_s30  ;;  %p707_p2 = scmp.lt.u32.totalorder %s703_s30, %s816_s4 }
 0x331   :  { %p709_p3 = pnand %p707_p2, %p704_p1 }
 0x333   :  { %712 = shalt.err (!%p709_p3)
}
 0x334   :  { %461 = dma.vmem_to_hbm [thread:$0]  %s459_s27, 128, %s816_s4, [#allocation4]  }
 0x335   :  { %717 = dma.done.wait [#allocation4], 128  }
 0x336   :  { %718 = vsyncadd [#allocation4], 4294967168 }
 0x337   :  { %465 = vsyncpa [#allocation3], 1 }
 0x338   :  { %466 = vsyncpa [#allocation6], 1 }
 0x339   :  { %467 = vsyncpa [#allocation4], 1 }

</bundles_post_ra>
